<compile_context>
chip_gen: v7x
topology: tpu7x:2x2x1
jax: 0.10.0
libtpu: 0.0.40
codegen_flags: <defaults>
</compile_context>

<pallas_src>
import jax
import jax.numpy as jnp
from jax.experimental import pallas as pl
from jax.experimental.pallas import tpu as pltpu


def _neat_mlp_kernel(x_ref, w1t_ref, b1_ref, w2t_ref, b2_ref, o_ref):
    # Row tile of x: feed the MXU bf16 operands, accumulate in f32.
    x = x_ref[...]
    if x.dtype != jnp.bfloat16:
        x = x.astype(jnp.bfloat16)

    # First matmul (MXU, bf16 x bf16 -> f32 accum) + f32 bias + f32 tanh (EUP).
    h = jnp.dot(x, w1t_ref[...], preferred_element_type=jnp.float32) + b1_ref[...]
    h = jnp.tanh(h)

    # Second matmul: cast activations to bf16 for the MXU, accumulate in f32.
    out = (
        jnp.dot(h.astype(jnp.bfloat16), w2t_ref[...],
                preferred_element_type=jnp.float32)
        + b2_ref[...]
    )
    o_ref[...] = out.astype(o_ref.dtype)


def neat_vector_field(t, x, params, *, tm=128):
    """Pallas equivalent of NEATVectorField.forward(t, x).

    `t` is ignored (as in the PyTorch module, where the loop variable shadows it).
    x: (n_timesteps, dim) -> output: (n_timesteps, dim)
    params: (W1^T:(D,H) bf16, b1:(1,H) f32, W2^T:(H,D) bf16, b2:(1,D) f32)
    """
    del t
    w1t, b1, w2t, b2 = params
    T, D = x.shape
    H = w1t.shape[1]

    tm = min(tm, T)
    grid = (pl.cdiv(T, tm),)

    # NOTE: for very large H, add a second "arbitrary" grid axis over the
    # hidden dim with an f32 VMEM accumulator to bound the (tm, H) intermediate.
    return pl.pallas_call(
        _neat_mlp_kernel,
        out_shape=jax.ShapeDtypeStruct((T, D), x.dtype),
        grid_spec=pltpu.PrefetchScalarGridSpec(
            num_scalar_prefetch=0,
            grid=grid,
            in_specs=[
                pl.BlockSpec((tm, D), lambda i: (i, 0)),   # x: tiled over rows
                pl.BlockSpec((D, H), lambda i: (0, 0)),    # W1^T: resident
                pl.BlockSpec((1, H), lambda i: (0, 0)),    # b1:   resident
                pl.BlockSpec((H, D), lambda i: (0, 0)),    # W2^T: resident
                pl.BlockSpec((1, D), lambda i: (0, 0)),    # b2:   resident
            ],
            out_specs=pl.BlockSpec((tm, D), lambda i: (i, 0)),
        ),
        compiler_params=pltpu.CompilerParams(
            dimension_semantics=("parallel",),     # shard rows across TCs on v7x
            vmem_limit_bytes=32 * 1024 * 1024,     # safe on v5e/v6e/v7x
        ),
    )(x, w1t, b1, w2t, b2)


def init_ffn_params(key, dim, hidden, weight_dtype=jnp.bfloat16):
    """Deterministic init of the 2-layer MLP ffn (PyTorch Linear convention:
    weight (out, in); we store the transpose, in bf16, for the MXU)."""
    k1, k2, k3, k4 = jax.random.split(key, 4)
    w1 = jax.random.normal(k1, (hidden, dim), jnp.float32) * 0.1  # Linear(dim, hidden).weight
    b1 = jax.random.normal(k2, (hidden,), jnp.float32) * 0.1
    w2 = jax.random.normal(k3, (dim, hidden), jnp.float32) * 0.1  # Linear(hidden, dim).weight
    b2 = jax.random.normal(k4, (dim,), jnp.float32) * 0.1
    return (
        w1.T.astype(weight_dtype),      # (D, H) bf16
        b1.reshape(1, hidden),          # (1, H) f32
        w2.T.astype(weight_dtype),      # (H, D) bf16
        b2.reshape(1, dim),             # (1, D) f32
    )


if __name__ == "__main__":
    key = jax.random.PRNGKey(0)
    kx, kp = jax.random.split(key)

    # Lane-dense, MXU-friendly sizes: D = H = 128, several row tiles of 128.
    n_timesteps, dim, hidden = 256, 128, 128
    x = jax.random.normal(kx, (n_timesteps, dim), jnp.float32)
    t = jnp.float32(0.0)  # unused, matches the PyTorch signature
    params = init_ffn_params(kp, dim, hidden)

    out = neat_vector_field(t, x, params, tm=128)
    out = jax.block_until_ready(out)

    # Pure-JAX reference mirroring the kernel's bf16-operand / f32-accum math.
    w1t, b1, w2t, b2 = params
    xb = x.astype(jnp.bfloat16)
    h_ref = jnp.tanh(jnp.dot(xb, w1t, preferred_element_type=jnp.float32) + b1)
    ref = (
        jnp.dot(h_ref.astype(jnp.bfloat16), w2t, preferred_element_type=jnp.float32)
        + b2
    ).astype(x.dtype)

    assert out.shape == x.shape and out.dtype == x.dtype
    assert jnp.allclose(out, ref, atol=1e-2, rtol=1e-2)

    print("KERNEL_OK")
</pallas_src>

<mosaic_0001>
module attributes {stable_mosaic.version = 11 : i64} {
  func.func @_neat_mlp_kernel(%arg0: i32, %arg1: memref<128x128xf32, #tpu.memory_space<vmem>>, %arg2: memref<128x128xbf16, #tpu.memory_space<vmem>>, %arg3: memref<1x128xf32, #tpu.memory_space<vmem>>, %arg4: memref<128x128xbf16, #tpu.memory_space<vmem>>, %arg5: memref<1x128xf32, #tpu.memory_space<vmem>>, %arg6: memref<128x128xf32, #tpu.memory_space<vmem>>) attributes {dimension_semantics = [#tpu.dimension_semantics<parallel>], iteration_bounds = array<i64: 2>, scalar_prefetch = 0 : i64, scratch_operands = 0 : i64, tpu.core_type = #tpu.core_type<tc>, window_params = [{transform_indices = @transform_0, window_bounds = array<i64: 128, 128>}, {pipeline_mode = #tpu.pipeline_mode<synchronous>, transform_indices = @transform_1, window_bounds = array<i64: 128, 128>}, {pipeline_mode = #tpu.pipeline_mode<synchronous>, transform_indices = @transform_2, window_bounds = array<i64: 1, 128>}, {pipeline_mode = #tpu.pipeline_mode<synchronous>, transform_indices = @transform_3, window_bounds = array<i64: 128, 128>}, {pipeline_mode = #tpu.pipeline_mode<synchronous>, transform_indices = @transform_4, window_bounds = array<i64: 1, 128>}, {transform_indices = @transform_5, window_bounds = array<i64: 128, 128>}]} {
    %c0 = arith.constant 0 : index
    %c0_0 = arith.constant 0 : index
    %0 = vector.load %arg1[%c0, %c0_0] : memref<128x128xf32, #tpu.memory_space<vmem>>, vector<128x128xf32>
    %1 = arith.truncf %0 : vector<128x128xf32> to vector<128x128xbf16>
    %c0_1 = arith.constant 0 : index
    %c0_2 = arith.constant 0 : index
    %2 = vector.load %arg2[%c0_1, %c0_2] : memref<128x128xbf16, #tpu.memory_space<vmem>>, vector<128x128xbf16>
    %cst = arith.constant dense<0.000000e+00> : vector<128x128xf32>
    %3 = tpu.matmul %1, %2, %cst {dimension_numbers = #tpu.dot_dimension_numbers<[1], [0], [0], [1], [0, 0, 1, 1], [], []>} : vector<128x128xbf16>, vector<128x128xbf16>, vector<128x128xf32> -> vector<128x128xf32>
    %c0_3 = arith.constant 0 : index
    %c0_4 = arith.constant 0 : index
    %4 = vector.load %arg3[%c0_3, %c0_4] : memref<1x128xf32, #tpu.memory_space<vmem>>, vector<1x128xf32>
    %5 = vector.broadcast %4 : vector<1x128xf32> to vector<128x128xf32>
    %6 = arith.addf %3, %5 : vector<128x128xf32>
    %7 = math.tanh %6 : vector<128x128xf32>
    %8 = arith.truncf %7 : vector<128x128xf32> to vector<128x128xbf16>
    %c0_5 = arith.constant 0 : index
    %c0_6 = arith.constant 0 : index
    %9 = vector.load %arg4[%c0_5, %c0_6] : memref<128x128xbf16, #tpu.memory_space<vmem>>, vector<128x128xbf16>
    %cst_7 = arith.constant dense<0.000000e+00> : vector<128x128xf32>
    %10 = tpu.matmul %8, %9, %cst_7 {dimension_numbers = #tpu.dot_dimension_numbers<[1], [0], [0], [1], [0, 0, 1, 1], [], []>} : vector<128x128xbf16>, vector<128x128xbf16>, vector<128x128xf32> -> vector<128x128xf32>
    %c0_8 = arith.constant 0 : index
    %c0_9 = arith.constant 0 : index
    %11 = vector.load %arg5[%c0_8, %c0_9] : memref<1x128xf32, #tpu.memory_space<vmem>>, vector<1x128xf32>
    %12 = vector.broadcast %11 : vector<1x128xf32> to vector<128x128xf32>
    %13 = arith.addf %10, %12 : vector<128x128xf32>
    %c0_10 = arith.constant 0 : index
    %c0_11 = arith.constant 0 : index
    %14 = vector.load %arg6[%c0_10, %c0_11] : memref<128x128xf32, #tpu.memory_space<vmem>>, vector<128x128xf32>
    tpu.vector_store %arg6[%c0_10, %c0_11], %13 {strides = array<i32>} : memref<128x128xf32, #tpu.memory_space<vmem>>, vector<128x128xf32>,
    return
  }
  func.func @transform_0(%arg0: i32) -> (i32, i32) {
    %c0_i32 = arith.constant 0 : i32
    %c0_i32_0 = arith.constant 0 : i32
    return %arg0, %c0_i32 : i32, i32
  }
  func.func @transform_1(%arg0: i32) -> (i32, i32) {
    %c0_i32 = arith.constant 0 : i32
    %c0_i32_0 = arith.constant 0 : i32
    %c0_i32_1 = arith.constant 0 : i32
    return %c0_i32, %c0_i32_0 : i32, i32
  }
  func.func @transform_2(%arg0: i32) -> (i32, i32) {
    %c0_i32 = arith.constant 0 : i32
    %c0_i32_0 = arith.constant 0 : i32
    %c0_i32_1 = arith.constant 0 : i32
    return %c0_i32, %c0_i32_0 : i32, i32
  }
  func.func @transform_3(%arg0: i32) -> (i32, i32) {
    %c0_i32 = arith.constant 0 : i32
    %c0_i32_0 = arith.constant 0 : i32
    %c0_i32_1 = arith.constant 0 : i32
    return %c0_i32, %c0_i32_0 : i32, i32
  }
  func.func @transform_4(%arg0: i32) -> (i32, i32) {
    %c0_i32 = arith.constant 0 : i32
    %c0_i32_0 = arith.constant 0 : i32
    %c0_i32_1 = arith.constant 0 : i32
    return %c0_i32, %c0_i32_0 : i32, i32
  }
  func.func @transform_5(%arg0: i32) -> (i32, i32) {
    %c0_i32 = arith.constant 0 : i32
    %c0_i32_0 = arith.constant 0 : i32
    return %arg0, %c0_i32 : i32, i32
  }
}

</mosaic_0001>

<bundles_post_ra>
// kernel: tpu_custom_call.1
= control target key start
LH: loop header
LB: loop body
LE: loop exit
PB: predicated region body
PF: predicated region fallthrough
CT: control target
= control target key end

     0   :  { %10 = vsyncpa [#allocation3], 0  ;;  %s1515_s0 = inlined_call_operand.hbm [shape: f32[256,128], index: 0, kind: input, shape index: {}]   ;;  %s1516_s1 = inlined_call_operand.hbm [shape: bf16[128,128], index: 1, kind: input, shape index: {}]   ;;  %s1517_s2 = inlined_call_operand.vmem [shape: f32[1,128], index: 2, kind: input, shape index: {}]   ;;  %s1518_s3 = inlined_call_operand.hbm [shape: bf16[128,128], index: 3, kind: input, shape index: {}]   ;;  %s1519_s4 = inlined_call_operand.vmem [shape: f32[1,128], index: 4, kind: input, shape index: {}]   ;;  %s1520_s5 = inlined_call_operand.hbm [shape: f32[256,128], index: 5, kind: output, shape index: {}]  }
   0x1   :  { %12 = vsyncpa [#allocation3 + $0x1], 0 }
   0x2   :  { %13 = vsyncpa [#allocation6], 0 }
   0x3   :  { %14 = vsyncpa [#allocation4], 0 }
   0x4   :  { %16 = vsyncpa [#allocation4 + $0x1], 0  ;;  %s1234_s18 = smov 0   ;;  %s1236_s19 = smov 0  }
   0x5   :  { %s1238_s20 = smov 0   ;;  %s1240_s21 = smov 0  }
   0x6 LB: > { %s1255_s22 = sadd.s32 4294967295, %s1192_s21   ;;  %s781_s23 = sadd.s32 4294967294, %s1192_s21   ;;  %s1192_s21 = sphi %s1240_s21, %s1540_s21   ;;  %s1188_s20 = sphi %s1238_s20, %s1539_s20   ;;  %s1184_s19 = sphi %s1236_s19, %s1538_s19   ;;  %s1180_s18 = sphi %s1234_s18, %s1537_s18  }
   0x7   : > { %p42_p0 = scmp.ne.s32.totalorder %s1184_s19, %s1180_s18  ;;  %p1521_p1 = scmp.eq.s32.totalorder %s1255_s22, 0 }
   0x8   : > { %p156_p3 = scmp.eq.s32.totalorder %s781_s23, 1  ;;  %p782_p5 = scmp.ge.s32.totalorder %s1192_s21, 1 }
   0x9   : > { %p1264_p4 = por %p1521_p1, %p42_p0  ;;  %p163_p7 = scmp.lt.s32.totalorder %s1192_s21, 3 }
   0xa   : > { %p1269_p6 = por %p156_p3, %p42_p0  ;;  %s1194_s27 = smov [#allocation5]  }
   0xb   : > { %s1524_s24 = scalar_select %p1264_p4, 1, 0 }
   0xc   : > { %s1525_s25 = scalar_select %p1269_p6, 1, 0 }
   0xd   : > { %p1274_p8 = pnand %p782_p5, %p163_p7  ;;  %s175_s28 = sshll.u32 %s1194_s27, 4  ;;  %s1278_s28 = int_to_ptr.vmem [resolvable:$true] %s175_s28 }
   0xe   : > { %s1195_s30 = smov [#allocation7]   ;;  %s1036_s9 = scalar_lea.hbm %s1516_s1, 1024 }
   0xf   : > { %p927_p9 = pneg %p1274_p8  ;;  %s191_s6 = sshll.u32 %s1195_s30, 4  ;;  %s1289_s6 = int_to_ptr.vmem [resolvable:$true] %s191_s6 }
  0x10   : > { %p1037_p12 = scmp.ne.s32.totalorder %s1516_s1, %s1036_s9  ;;  %p1043_p5 = scmp.lt.u32.totalorder %s1036_s9, %s1516_s1 }
  0x11   : > { %p1285_p11 = pnand %p927_p9, %p1521_p1 }
  0x13   : > { %p1038_p13 = pneg %p1285_p11 }
  0x15   : > { %p1039_p0 = pnand %p1038_p13, %p1037_p12 }
  0x17   : > { %p1040_p3 = pneg %p1039_p0 }
  0x19   : > { %p1045_p7 = pnand %p1043_p5, %p1040_p3 }
  0x1b   : > { %1048 = shalt.err (!%p1045_p7)
}
  0x1c   : > { %s1049_s14 = scalar_lea.vmem %s1278_s28, 1024  ;;  %p1057_p2 = scmp.lt.s32.totalorder %s1278_s28, %s1278_s28 }
  0x1d   : > { %p1050_p9 = scmp.ne.s32.totalorder %s1278_s28, %s1049_s14  ;;  %p1058_p12 = scmp.lt.s32.totalorder %s1049_s14, %s1049_s14 }
  0x1f   : > { %p1052_p10 = pnand %p1050_p9, %p1038_p13  ;;  %p1059_p0 = por %p1058_p12, %p1057_p2 }
  0x21   : > { %p1053_p1 = pneg %p1052_p10 }
  0x23   : > { %p1060_p6 = pnand %p1059_p0, %p1053_p1 }
  0x25   : > { %1063 = shalt.err (!%p1060_p6)
}
  0x26   : > { %s1196_s15 = smov 64   ;;  %s1197_s16 = smov 4  }
  0x27   : > { %930 = dma.hbm_to_vmem [thread:$0]  (!%p1285_p11), %s1516_s1, 1024, %s1278_s28, [#allocation6], %s1196_s15, %s1196_s15, %s1197_s16  }
  0x28   : > { %s1064_s7 = scalar_lea.hbm %s1518_s3, 1024 }
  0x29   : > { %p1065_p2 = scmp.ne.s32.totalorder %s1518_s3, %s1064_s7  ;;  %p1071_p10 = scmp.lt.u32.totalorder %s1064_s7, %s1518_s3 }
  0x2b   : > { %p1067_p1 = pnand %p1065_p2, %p1038_p13 }
  0x2d   : > { %p1068_p6 = pneg %p1067_p1 }
  0x2f   : > { %p1073_p3 = pnand %p1071_p10, %p1068_p6 }
  0x31   : > { %1076 = shalt.err (!%p1073_p3)
}
  0x32   : > { %s1077_s28 = scalar_lea.vmem %s1289_s6, 1024  ;;  %p1085_p12 = scmp.lt.s32.totalorder %s1289_s6, %s1289_s6 }
  0x33   : > { %p1078_p5 = scmp.ne.s32.totalorder %s1289_s6, %s1077_s28  ;;  %p1086_p0 = scmp.lt.s32.totalorder %s1077_s28, %s1077_s28 }
  0x35   : > { %p1080_p7 = pnand %p1078_p5, %p1038_p13  ;;  %p1087_p2 = por %p1086_p0, %p1085_p12 }
  0x37   : > { %p1081_p9 = pneg %p1080_p7 }
  0x39   : > { %p1088_p1 = pnand %p1087_p2, %p1081_p9 }
  0x3b   : > { %1091 = shalt.err (!%p1088_p1)
}
  0x3c   : > { %933 = dma.hbm_to_vmem [thread:$0]  (!%p1285_p11), %s1518_s3, 1024, %s1289_s6, [#allocation6], %s1196_s15, %s1196_s15, %s1197_s16  }
  0x3d   : > { %s1344_s14 = sadd.s32 1, %s1192_s21   ;;  %s29_s29 = sadd.s32 1, %s1188_s20 }
  0x3e   : > { %s26_s17 = ssub.s32 %s1192_s21, %s1344_s14  ;;  %p36_p13 = scmp.ne.s32.totalorder %s1188_s20, %s1184_s19 }
  0x3f   : > { %p27_p6 = scmp.eq.s32.totalorder %s26_s17, 0  ;;  %p37_p10 = scmp.eq.s32.totalorder %s1192_s21, 0 }
  0x40   : > { %p1528_p3 = scmp.eq.s32.totalorder %s1255_s22, 1  ;;  %p944_p7 = scmp.lt.s32.totalorder %s1192_s21, 2 }
  0x41   : > { %s1360_s27 = scalar_select %p27_p6, %s1188_s20, %s29_s29  }
  0x42   : > { %p1354_p5 = por %p1528_p3, %p36_p13  ;;  %p38_p9 = por %p37_p10, %p36_p13 }
  0x43   : > { %s208_s30 = sand.u32 1, %s1188_s20   ;;  %s817_s6 = sshll.u32 %s1192_s21, 11 }
  0x44   : > { %s1529_s23 = scalar_select %p1354_p5, 1, 0 }
  0x45   : > { %s786_s7 = sshll.u32 %s208_s30, 7  ;;  %s1367_s8 = scalar_lea.hbm %s1515_s0, %s817_s6 }
  0x46   : > { %s212_s9 = scalar_lea.vmem [#allocation2], %s786_s7  ;;  %p1371_p11 = pnand %p944_p7, %p38_p9 }
  0x47   : > { %s219_s10 = sshll.u32 %s212_s9, 4  ;;  %s1375_s28 = scalar_lea.sflag [#allocation3], %s208_s30  ;;  %s1369_s10 = int_to_ptr.vmem [resolvable:$true] %s219_s10 }
  0x48   : > { %s1092_s12 = scalar_lea.hbm %s1367_s8, 2048  ;;  %p1094_p0 = pneg %p1371_p11 }
  0x49   : > { %p1093_p12 = scmp.ne.s32.totalorder %s1367_s8, %s1092_s12  ;;  %s1097_s17 = scalar_lea.hbm %s1515_s0, 4096 }
  0x4a   : > { %p1098_p13 = scmp.lt.u32.totalorder %s1367_s8, %s1515_s0  ;;  %p1099_p6 = scmp.lt.u32.totalorder %s1097_s17, %s1092_s12 }
  0x4b   : > { %p1095_p2 = pnand %p1094_p0, %p1093_p12  ;;  %p1101_p3 = scmp.lt.u32.totalorder %s1092_s12, %s1367_s8 }
  0x4c   : > { %p1100_p10 = por %p1099_p6, %p1098_p13 }
  0x4d   : > { %p1096_p1 = pneg %p1095_p2 }
  0x4e   : > { %p1102_p7 = por %p1101_p3, %p1100_p10 }
  0x50   : > { %p1103_p9 = pnand %p1102_p7, %p1096_p1 }
  0x52   : > { %1106 = shalt.err (!%p1103_p9)
}
  0x53   : > { %s1107_s30 = scalar_lea.vmem %s1369_s10, 2048  ;;  %s1198_s15 = smov [#allocation2]  }
  0x54   : > { %p1108_p12 = scmp.ne.s32.totalorder %s1369_s10, %s1107_s30  ;;  %s1112_s16 = sshll.u32 %s1198_s15, 4  ;;  %s1113_s16 = int_to_ptr.vmem [resolvable:$false] %s1112_s16 }
  0x55   : > { %s1114_s9 = scalar_lea.vmem %s1113_s16, 4096  ;;  %p1115_p4 = scmp.lt.s32.totalorder %s1369_s10, %s1113_s16 }
  0x56   : > { %p1110_p2 = pnand %p1108_p12, %p1094_p0  ;;  %p1116_p13 = scmp.lt.s32.totalorder %s1114_s9, %s1107_s30 }
  0x58   : > { %p1111_p5 = pneg %p1110_p2  ;;  %p1117_p6 = por %p1116_p13, %p1115_p4 }
  0x5a   : > { %p1118_p10 = pnand %p1117_p6, %p1111_p5 }
  0x5c   : > { %1121 = shalt.err (!%p1118_p10)
}
  0x5d   : > { %s1199_s12 = smov 128   ;;  %s1200_s13 = smov 8  }
  0x5e   : > { %937 = dma.hbm_to_vmem [thread:$0]  (!%p1371_p11), %s1367_s8, 2048, %s1369_s10, %s1375_s28, %s1199_s12, %s1199_s12, %s1200_s13  }
  0x5f   : > { %231 = sbr.rel (%p1274_p8) target bundleno = 626 (0x272), region = 40  ;;  %s1406_s29 = sand.u32 (!%p1274_p8), 1, %s1184_s19  }
  0x60   : > { %s790_s17 = sshll.u32 (!%p1274_p8), %s1406_s29, 7  ;;  %s234_s7 = scalar_lea.sflag (!%p1274_p8), [#allocation3], %s1406_s29 }
  0x61   : > { %s1412_s6 = scalar_lea.vmem (!%p1274_p8), [#allocation2], %s790_s17  ;;  %p1531_p4 = scmp.ne.s32.totalorder (!%p1274_p8), %s1524_s24, 0 }
  0x66   : > { %1167 = dma.done.wait (%p1531_p4), %s234_s7, 2048  }
  0x67   : > { %1169 = vsyncadd (%p1531_p4), %s234_s7, 4294965248  ;;  %p1532_p5 = scmp.eq.s32.totalorder %s1255_s22, 0 }
  0x69   : > { %1171 = dma.done.wait (%p1532_p5), [#allocation6], 2048   ;;  %p1533_p8 = pmov %p1532_p5 }
  0x6a   : > { %v988_v0 = vld [vmem:[#allocation5] sm:$0xff]   ;;  %v989_v1 = vld [vmem:[#allocation5 + $0x8] sm:$0xff]   ;;  %v990_v2 = vld [vmem:[#allocation5 + $0x10] sm:$0xff]   ;;  %s1446_s11 = scalar_lea.vmem [#allocation8], %s790_s17  ;;  %s818_s28 = sshll.u32 %s1255_s22, 11 }
  0x6b   : > { %1173 = vsyncadd (%p1533_p8), [#allocation6], 4294965248  ;;  %851 = vmatprep.subr.bf16.mxu0 %v988_v0  ;;  %v991_v3 = vld [vmem:[#allocation5 + $0x18] sm:$0xff]   ;;  %v275_v4 = vld [vmem:[%s1412_s6] sm:$0xff]  ;;  %s689_s30 = sshll.u32 %s1446_s11, 4  ;;  %s1466_s9 = scalar_lea.hbm %s1520_s5, %s818_s28  ;;  %s1468_s30 = int_to_ptr.vmem [resolvable:$true] %s689_s30 }
  0x6c   : > { %852 = vmatpush3.bf16.msra.mxu0 %v988_v0  ;;  %v276_v5 = vld [vmem:[%s1412_s6 + $0x8] sm:$0xff]  ;;  %v992_v7 = vld [vmem:[#allocation5 + $0x20] sm:$0xff]   ;;  %v998_v11 = vld [vmem:[#allocation7 + $0x10] sm:$0xff]   ;;  %s676_s22 = scalar_lea.sflag [#allocation4], %s1406_s29  ;;  %s1122_s12 = scalar_lea.vmem %s1468_s30, 2048 }
  0x6d   : > { %853 = vmatprep.subr.bf16.mxu0 %v989_v1  ;;  %v291_v6 = vpack.c.bf16 %v276_v5, %v275_v4  ;;  %v993_v8 = vld [vmem:[#allocation5 + $0x28] sm:$0xff]   ;;  %v996_v9 = vld [vmem:[#allocation7] sm:$0xff]   ;;  %v994_v12 = vld [vmem:[#allocation5 + $0x30] sm:$0xff]   ;;  %p1123_p11 = scmp.ne.s32.totalorder %s1468_s30, %s1122_s12  ;;  %p1534_p0 = scmp.ne.s32.totalorder %s1529_s23, 0 }
  0x6e   : > { %v997_v10 = vld [vmem:[#allocation7 + $0x8] sm:$0xff]   ;;  %883 = vmatprep.subr.bf16.mxu1 %v996_v9  ;;  %v995_v13 = vld [vmem:[#allocation5 + $0x38] sm:$0xff]   ;;  %v277_v14 = vld [vmem:[%s1412_s6 + $0x10] sm:$0xff]  ;;  %s1201_s13 = smov [#allocation8]  }
  0x6f   : > { %867 = vmatprep.mubr.bf16.mxu0 %v291_v6  ;;  %884 = vmatpush3.bf16.msra.mxu1 %v996_v9  ;;  %v278_v15 = vld [vmem:[%s1412_s6 + $0x18] sm:$0xff]  ;;  %v279_v16 = vld [vmem:[%s1412_s6 + $0x20] sm:$0xff]  ;;  %v280_v17 = vld [vmem:[%s1412_s6 + $0x28] sm:$0xff]  ;;  %p1124_p1 = pnand %p1123_p11, %p1534_p0  ;;  %s1126_s17 = sshll.u32 %s1201_s13, 4  ;;  %s1127_s17 = int_to_ptr.vmem [resolvable:$false] %s1126_s17 }
  0x70   : > { %854 = vmatpush3.bf16.msra.mxu0 %v989_v1  ;;  %885 = vmatprep.subr.bf16.mxu1 %v997_v10  ;;  %v292_v18 = vpack.c.bf16 %v278_v15, %v277_v14  ;;  %v293_v19 = vpack.c.bf16 %v280_v17, %v279_v16  ;;  %v281_v20 = vld [vmem:[%s1412_s6 + $0x30] sm:$0xff]  ;;  %v282_v21 = vld [vmem:[%s1412_s6 + $0x38] sm:$0xff]  ;;  %v283_v22 = vld [vmem:[%s1412_s6 + $0x40] sm:$0xff]  ;;  %s1128_s7 = scalar_lea.vmem %s1127_s17, 4096  ;;  %p1129_p7 = scmp.lt.s32.totalorder %s1468_s30, %s1127_s17 }
  0x71   : > { %855 = vmatprep.subr.bf16.mxu0 %v990_v2  ;;  %v284_v23 = vld [vmem:[%s1412_s6 + $0x48] sm:$0xff]  ;;  %v294_v24 = vpack.c.bf16 %v282_v21, %v281_v20  ;;  %v285_v26 = vld [vmem:[%s1412_s6 + $0x50] sm:$0xff]  ;;  %v286_v27 = vld [vmem:[%s1412_s6 + $0x58] sm:$0xff]  ;;  %p1125_p3 = pneg %p1124_p1  ;;  %p1130_p9 = scmp.lt.s32.totalorder %s1128_s7, %s1122_s12 }
  0x72   : > { %v295_v25 = vpack.c.bf16 %v284_v23, %v283_v22  ;;  %v287_v28 = vld [vmem:[%s1412_s6 + $0x60] sm:$0xff]  ;;  %v288_v29 = vld [vmem:[%s1412_s6 + $0x68] sm:$0xff]  ;;  %v296_v30 = vpack.c.bf16 %v286_v27, %v285_v26  ;;  %v289_v32 = vld [vmem:[%s1412_s6 + $0x70] sm:$0xff] }
  0x73   : > { %886 = vmatpush3.bf16.msra.mxu1 %v997_v10  ;;  %v297_v31 = vpack.c.bf16 %v288_v29, %v287_v28  ;;  %v290_v33 = vld [vmem:[%s1412_s6 + $0x78] sm:$0xff]  ;;  %v1000_v36 = vld [vmem:[#allocation7 + $0x20] sm:$0xff]   ;;  %v1001_v37 = vld [vmem:[#allocation7 + $0x28] sm:$0xff]   ;;  %p1131_p12 = por %p1130_p9, %p1129_p7 }
  0x74   : > { %856 = vmatpush3.bf16.msra.mxu0 %v990_v2  ;;  %887 = vmatprep.subr.bf16.mxu1 %v998_v11  ;;  %v298_v34 = vpack.c.bf16 %v290_v33, %v289_v32  ;;  %v999_v35 = vld [vmem:[#allocation7 + $0x18] sm:$0xff]   ;;  %v1002_v38 = vld [vmem:[#allocation7 + $0x30] sm:$0xff]   ;;  %v794_v40 = vld [vmem:[%s1517_s2] ss:$0 sm:$0xff] }
  0x75   : > { %857 = vmatprep.subr.bf16.mxu0 %v991_v3  ;;  %v1003_v39 = vld [vmem:[#allocation7 + $0x38] sm:$0xff]   ;;  %v803_v33 = vld [vmem:[%s1519_s4] ss:$0 sm:$0xff]  ;;  %p1132_p2 = pnand %p1131_p12, %p1125_p3 }
  0x77   : > { %888 = vmatpush3.bf16.msra.mxu1 %v998_v11 }
  0x78   : > { %858 = vmatpush3.bf16.msra.mxu0 %v991_v3  ;;  %889 = vmatprep.subr.bf16.mxu1 %v999_v35 }
  0x79   : > { %859 = vmatprep.subr.bf16.mxu0 %v992_v7 }
  0x7b   : > { %890 = vmatpush3.bf16.msra.mxu1 %v999_v35 }
  0x7c   : > { %860 = vmatpush3.bf16.msra.mxu0 %v992_v7  ;;  %891 = vmatprep.subr.bf16.mxu1 %v1000_v36 }
  0x7d   : > { %861 = vmatprep.subr.bf16.mxu0 %v993_v8 }
  0x7f   : > { %892 = vmatpush3.bf16.msra.mxu1 %v1000_v36 }
  0x80   : > { %862 = vmatpush3.bf16.msra.mxu0 %v993_v8  ;;  %893 = vmatprep.subr.bf16.mxu1 %v1001_v37 }
  0x81   : > { %863 = vmatprep.subr.bf16.mxu0 %v994_v12 }
  0x83   : > { %894 = vmatpush3.bf16.msra.mxu1 %v1001_v37 }
  0x84   : > { %864 = vmatpush3.bf16.msra.mxu0 %v994_v12  ;;  %895 = vmatprep.subr.bf16.mxu1 %v1002_v38 }
  0x85   : > { %865 = vmatprep.subr.bf16.mxu0 %v995_v13 }
  0x87   : > { %896 = vmatpush3.bf16.msra.mxu1 %v1002_v38 }
  0x88   : > { %866 = vmatpush3.bf16.msra.mxu0 %v995_v13  ;;  %897 = vmatprep.subr.bf16.mxu1 %v1003_v39 }
  0x8b   : > { %868 = vmatmul.mubr.bf16.vlgmr.msra.gmra.mrb[0].mxu0 %v292_v18  ;;  %898 = vmatpush3.bf16.msra.mxu1 %v1003_v39 }
  0x8c   : > { %871 = vmatprep.mubr.bf16.mxu0 %v293_v19 }
  0x93   : > { %872 = vmatmul.mubr.bf16.gmra.mrb[4].mxu0 %v294_v24 }
  0x94   : > { %875 = vmatprep.mubr.bf16.mxu0 %v295_v25 }
  0x9b   : > { %876 = vmatmul.mubr.bf16.gmra.mrb[8].mxu0 %v296_v30 }
  0x9c   : > { %879 = vmatprep.mubr.bf16.mxu0 %v297_v31 }
  0xa3   : > { %880 = vmatmul.mubr.bf16.gmra.mrb[12].mxu0 %v298_v34 }
 0x15e   : > { %v869_v41 = vpop.f32.mrb[0].mxu0 }
 0x15f   : > { %v413_v42 = vadd.f32 %v869_v41, %v794_v40  ;;  %v404_v43 = vpop.f32.mrb[1].mxu0 }
 0x160   : > { %v405_v44 = vadd.f32 %v794_v40, %v404_v43  ;;  %v870_v45 = vpop.f32.mrb[2].mxu0 }
 0x161   : > { %1004 = vtanh.f32 %v413_v42  ;;  %v416_v46 = vadd.f32 %v870_v45, %v794_v40  ;;  %v407_v47 = vpop.f32.mrb[3].mxu0 }
 0x162   : > { %1006 = vtanh.f32 %v405_v44  ;;  %v408_v48 = vadd.f32 %v794_v40, %v407_v47 }
 0x163   : > { %1008 = vtanh.f32 %v416_v46 }
 0x164   : > { %1010 = vtanh.f32 %v408_v48 }
 0x166   : > { %v873_v49 = vpop.f32.mrb[4].mxu0 }
 0x167   : > { %v429_v50 = vadd.f32 %v873_v49, %v794_v40  ;;  %v420_v51 = vpop.f32.mrb[5].mxu0 }
 0x168   : > { %v421_v52 = vadd.f32 %v794_v40, %v420_v51  ;;  %v874_v53 = vpop.f32.mrb[6].mxu0 }
 0x169   : > { %1012 = vtanh.f32 %v429_v50  ;;  %v432_v54 = vadd.f32 %v874_v53, %v794_v40  ;;  %v423_v55 = vpop.f32.mrb[7].mxu0 }
 0x16a   : > { %1014 = vtanh.f32 %v421_v52  ;;  %v424_v56 = vadd.f32 %v794_v40, %v423_v55 }
 0x16b   : > { %v1005_v57 = vpop.eup %1004  ;;  %1016 = vtanh.f32 %v432_v54 }
 0x16c   : > { %v1007_v58 = vpop.eup %1006  ;;  %1018 = vtanh.f32 %v424_v56 }
 0x16d   : > { %v1009_v59 = vpop.eup %1008 }
 0x16e   : > { %v1011_v60 = vpop.eup %1010  ;;  %v877_v61 = vpop.f32.mrb[8].mxu0  ;;  %v484_v62 = vpack.c.bf16 %v1009_v59, %v1005_v57 }
 0x16f   : > { %v445_v63 = vadd.f32 %v877_v61, %v794_v40  ;;  %v436_v0 = vpop.f32.mrb[9].mxu0  ;;  %v483_v1 = vpack.c.bf16 %v1011_v60, %v1007_v58 }
 0x170   : > { %v437_v2 = vadd.f32 %v794_v40, %v436_v0  ;;  %v878_v3 = vpop.f32.mrb[10].mxu0 }
 0x171   : > { %1020 = vtanh.f32 %v445_v63  ;;  %v448_v4 = vadd.f32 %v878_v3, %v794_v40  ;;  %v439_v5 = vpop.f32.mrb[11].mxu0  ;;  %899 = vmatprep.mubr.bf16.mxu1 %v483_v1 }
 0x172   : > { %1022 = vtanh.f32 %v437_v2  ;;  %v440_v6 = vadd.f32 %v794_v40, %v439_v5  ;;  %900 = vmatmul.mubr.bf16.vlgmr.msra.gmra.mrb[0].mxu1 %v484_v62 }
 0x173   : > { %v1013_v7 = vpop.eup %1012  ;;  %1024 = vtanh.f32 %v448_v4 }
 0x174   : > { %v1015_v8 = vpop.eup %1014  ;;  %1026 = vtanh.f32 %v440_v6 }
 0x175   : > { %v1017_v9 = vpop.eup %1016 }
 0x176   : > { %v1019_v10 = vpop.eup %1018  ;;  %v881_v11 = vpop.f32.mrb[12].mxu0  ;;  %v486_v12 = vpack.c.bf16 %v1017_v9, %v1013_v7 }
 0x177   : > { %v461_v13 = vadd.f32 %v881_v11, %v794_v40  ;;  %v452_v14 = vpop.f32.mrb[13].mxu0  ;;  %v485_v15 = vpack.c.bf16 %v1019_v10, %v1015_v8 }
 0x178   : > { %v453_v16 = vadd.f32 %v794_v40, %v452_v14  ;;  %v882_v17 = vpop.f32.mrb[14].mxu0 }
 0x179   : > { %1028 = vtanh.f32 %v461_v13  ;;  %v464_v18 = vadd.f32 %v882_v17, %v794_v40  ;;  %v455_v19 = vpop.f32.mrb[15].mxu0  ;;  %903 = vmatprep.mubr.bf16.mxu1 %v485_v15 }
 0x17a   : > { %1030 = vtanh.f32 %v453_v16  ;;  %v456_v20 = vadd.f32 %v794_v40, %v455_v19  ;;  %904 = vmatmul.mubr.bf16.gmra.mrb[4].mxu1 %v486_v12 }
 0x17b   : > { %v1021_v21 = vpop.eup %1020  ;;  %1032 = vtanh.f32 %v464_v18 }
 0x17c   : > { %v1023_v22 = vpop.eup %1022  ;;  %1034 = vtanh.f32 %v456_v20 }
 0x17d   : > { %v1025_v23 = vpop.eup %1024 }
 0x17e   : > { %v1027_v24 = vpop.eup %1026  ;;  %v488_v25 = vpack.c.bf16 %v1025_v23, %v1021_v21 }
 0x17f   : > { %v487_v26 = vpack.c.bf16 %v1027_v24, %v1023_v22 }
 0x181   : > { %907 = vmatprep.mubr.bf16.mxu1 %v487_v26 }
 0x182   : > { %908 = vmatmul.mubr.bf16.gmra.mrb[8].mxu1 %v488_v25 }
 0x183   : > { %v1029_v27 = vpop.eup %1028 }
 0x184   : > { %v1031_v28 = vpop.eup %1030 }
 0x185   : > { %v1033_v29 = vpop.eup %1032 }
 0x186   : > { %v1035_v30 = vpop.eup %1034  ;;  %v490_v31 = vpack.c.bf16 %v1033_v29, %v1029_v27 }
 0x187   : > { %v489_v32 = vpack.c.bf16 %v1035_v30, %v1031_v28 }
 0x189   : > { %911 = vmatprep.mubr.bf16.mxu1 %v489_v32 }
 0x18a   : > { %912 = vmatmul.mubr.bf16.gmra.mrb[12].mxu1 %v490_v31 }
 0x245   : > { %v901_v34 = vpop.f32.mrb[0].mxu1 }
 0x246   : > { %v605_v35 = vadd.f32 %v901_v34, %v803_v33  ;;  %v596_v36 = vpop.f32.mrb[1].mxu1 }
 0x247   : > { %v597_v37 = vadd.f32 %v803_v33, %v596_v36  ;;  %v902_v38 = vpop.f32.mrb[2].mxu1 }
 0x248   : > { %661 = vst [vmem:[%s1446_s11 + $0x10] sm:$0xff] %v605_v35  ;;  %v608_v39 = vadd.f32 %v902_v38, %v803_v33  ;;  %v599_v40 = vpop.f32.mrb[3].mxu1 }
 0x249   : > { %659 = vst [vmem:[%s1446_s11] sm:$0xff] %v597_v37  ;;  %v600_v41 = vadd.f32 %v803_v33, %v599_v40 }
 0x24a   : > { %662 = vst [vmem:[%s1446_s11 + $0x18] sm:$0xff] %v608_v39 }
 0x24b   : > { %660 = vst [vmem:[%s1446_s11 + $0x8] sm:$0xff] %v600_v41 }
 0x24d   : > { %v905_v42 = vpop.f32.mrb[4].mxu1 }
 0x24e   : > { %v621_v43 = vadd.f32 %v905_v42, %v803_v33  ;;  %v612_v44 = vpop.f32.mrb[5].mxu1 }
 0x24f   : > { %v613_v45 = vadd.f32 %v803_v33, %v612_v44  ;;  %v906_v46 = vpop.f32.mrb[6].mxu1 }
 0x250   : > { %665 = vst [vmem:[%s1446_s11 + $0x30] sm:$0xff] %v621_v43  ;;  %v624_v47 = vadd.f32 %v906_v46, %v803_v33  ;;  %v615_v48 = vpop.f32.mrb[7].mxu1 }
 0x251   : > { %663 = vst [vmem:[%s1446_s11 + $0x20] sm:$0xff] %v613_v45  ;;  %v616_v49 = vadd.f32 %v803_v33, %v615_v48 }
 0x252   : > { %666 = vst [vmem:[%s1446_s11 + $0x38] sm:$0xff] %v624_v47 }
 0x253   : > { %664 = vst [vmem:[%s1446_s11 + $0x28] sm:$0xff] %v616_v49 }
 0x255   : > { %v909_v50 = vpop.f32.mrb[8].mxu1 }
 0x256   : > { %v637_v51 = vadd.f32 %v909_v50, %v803_v33  ;;  %v628_v52 = vpop.f32.mrb[9].mxu1 }
 0x257   : > { %v629_v53 = vadd.f32 %v803_v33, %v628_v52  ;;  %v910_v54 = vpop.f32.mrb[10].mxu1 }
 0x258   : > { %669 = vst [vmem:[%s1446_s11 + $0x50] sm:$0xff] %v637_v51  ;;  %v640_v55 = vadd.f32 %v910_v54, %v803_v33  ;;  %v631_v56 = vpop.f32.mrb[11].mxu1 }
 0x259   : > { %667 = vst [vmem:[%s1446_s11 + $0x40] sm:$0xff] %v629_v53  ;;  %v632_v57 = vadd.f32 %v803_v33, %v631_v56 }
 0x25a   : > { %670 = vst [vmem:[%s1446_s11 + $0x58] sm:$0xff] %v640_v55 }
 0x25b   : > { %668 = vst [vmem:[%s1446_s11 + $0x48] sm:$0xff] %v632_v57 }
 0x25d   : > { %v913_v58 = vpop.f32.mrb[12].mxu1 }
 0x25e   : > { %v653_v59 = vadd.f32 %v913_v58, %v803_v33  ;;  %v644_v60 = vpop.f32.mrb[13].mxu1 }
 0x25f   : > { %v645_v61 = vadd.f32 %v803_v33, %v644_v60  ;;  %v914_v62 = vpop.f32.mrb[14].mxu1 }
 0x260   : > { %673 = vst [vmem:[%s1446_s11 + $0x70] sm:$0xff] %v653_v59  ;;  %v656_v63 = vadd.f32 %v914_v62, %v803_v33  ;;  %v647_v0 = vpop.f32.mrb[15].mxu1 }
 0x261   : > { %671 = vst [vmem:[%s1446_s11 + $0x60] sm:$0xff] %v645_v61  ;;  %v648_v1 = vadd.f32 %v803_v33, %v647_v0 }
 0x262   : > { %674 = vst [vmem:[%s1446_s11 + $0x78] sm:$0xff] %v656_v63 }
 0x263   : > { %672 = vst [vmem:[%s1446_s11 + $0x68] sm:$0xff] %v648_v1 }
 0x264   : > { %1135 = shalt.err (!%p1132_p2)
}
 0x265   : > { %s1136_s6 = scalar_lea.hbm %s1466_s9, 2048  ;;  %s1140_s8 = scalar_lea.hbm %s1520_s5, 4096 }
 0x266   : > { %p1137_p13 = scmp.ne.s32.totalorder %s1466_s9, %s1136_s6  ;;  %p1141_p4 = scmp.lt.u32.totalorder %s1466_s9, %s1520_s5 }
 0x267   : > { %p1142_p5 = scmp.lt.u32.totalorder %s1140_s8, %s1136_s6  ;;  %p1144_p11 = scmp.lt.u32.totalorder %s1136_s6, %s1466_s9 }
 0x268   : > { %p1138_p6 = pnand %p1137_p13, %p1534_p0 }
 0x269   : > { %p1143_p8 = por %p1142_p5, %p1141_p4 }
 0x26a   : > { %p1139_p10 = pneg %p1138_p6 }
 0x26b   : > { %p1145_p1 = por %p1144_p11, %p1143_p8 }
 0x26d   : > { %p1146_p3 = pnand %p1145_p1, %p1139_p10 }
 0x26f   : > { %1149 = shalt.err (!%p1146_p3)
}
 0x270   : > { %s1202_s28 = smov 128   ;;  %s1203_s15 = smov 8  }
 0x271   : > { %925 = dma.vmem_to_hbm [thread:$0]  (%p1534_p0), %s1468_s30, 2048, %s1466_s9, %s676_s22, %s1202_s28, %s1202_s28, %s1203_s15  }
 0x272 PF: > { %s704_s16 = sand.u32 1, %s1180_s18   ;;  %p1535_p7 = scmp.ne.s32.totalorder %s1525_s25, 0 }
 0x273   : > { %p1536_p9 = scmp.ge.s32.totalorder %s1192_s21, 2  ;;  %s705_s12 = scalar_lea.sflag [#allocation4], %s704_s16 }
 0x275   : > { %p939_p12 = pnand %p1536_p9, %p1535_p7 }
 0x277   : > { %1175 = dma.done.wait (!%p939_p12), %s705_s12, 2048  }
 0x278   : > { %1177 = vsyncadd (!%p939_p12), %s705_s12, 4294965248  ;;  %p19_p2 = scmp.ge.s32.totalorder %s1344_s14, 4   ;;  %s1537_s18 = smov %s1184_s19 }
 0x279   : > { %s1538_s19 = smov %s1188_s20  ;;  %s1539_s20 = smov %s1360_s27 }
 0x27a   : > { %s1540_s21 = smov %s1344_s14  ;;  %21 = sbr.rel (!%p19_p2) target bundleno = 6 (0x6), region = 93 }
 0x281   :  { %710 = vsyncpa [#allocation3], 1 }
 0x282   :  { %712 = vsyncpa [#allocation3 + $0x1], 1 }
 0x283   :  { %713 = vsyncpa [#allocation6], 1 }
 0x284   :  { %714 = vsyncpa [#allocation4], 1 }
 0x285   :  { %716 = vsyncpa [#allocation4 + $0x1], 1 }

</bundles_post_ra>
